<compile_context>
chip_gen: v6e
topology: v6e:2x2x1
jax: 0.10.0
libtpu: 0.0.40
codegen_flags: <defaults>
</compile_context>

<pallas_src>
import jax
import jax.numpy as jnp
from jax.experimental import pallas as pl
from jax.experimental.pallas import tpu as pltpu


def _round_up(x, m):
    return ((x + m - 1) // m) * m


def _lane_pad_bytes(rows, cols, itemsize=4):
    # VMEM pads the last dim to 128 lanes and the second-last to 8 sublanes.
    return _round_up(max(rows, 1), 8) * _round_up(max(cols, 1), 128) * itemsize


_UNROLL_T_MAX = 16          # full static unroll below this; fori_loop above


# ----------------------------------------------------------------------------- #
# Kernel
# ----------------------------------------------------------------------------- #
def _rnn_kernel(x_ref,          # (T, Bt, obs)   time-major batch tile
                in_shift_ref,   # (1, obs)
                inv_scale_ref,  # (1, obs)   = 1 / (in_scale + 1e-8)
                w_ih_ref,       # (obs, Hp)  Hp = rnn_hidden padded to 128
                w_hh_ref,       # (Hp, Hp)
                b_rnn_ref,      # (1, Hp)    = b_ih + b_hh (padded)
                w_fc_ref,       # (Hp, Hmp)  Hmp = mlp_hidden padded to 128
                b_fc_ref,       # (1, Hmp)
                w_out_ref,      # (Hmp, Ap)  Ap = act_dim padded to 128
                b_out_ref,      # (1, Ap)
                out_scale_ref,  # (1, Ap)
                out_shift_ref,  # (1, Ap)
                out_ref,        # (Bt, Ap)
                xproj_ref):     # scratch (T, Bt, Hp) f32
    T, Bt, obs = x_ref.shape
    Hp = w_hh_ref.shape[0]

    # ---- hoisted non-recurrent work: one elementwise pass + ONE MXU matmul ----
    x2d = x_ref[...].reshape(T * Bt, obs)           # major-dim merge (Bt % 8 == 0)
    xn = (x2d - in_shift_ref[...]) * inv_scale_ref[...]
    xproj = jnp.dot(xn, w_ih_ref[...],
                    preferred_element_type=jnp.float32) + b_rnn_ref[...]
    xproj_ref[...] = xproj.reshape(T, Bt, Hp)

    # ---- serial recurrence: only h @ W_hh + tanh on the critical path ---------
    w_hh = w_hh_ref[...]
    h = jnp.tanh(xproj_ref[0])                      # h0 == 0  =>  h0 @ W_hh == 0

    if T <= _UNROLL_T_MAX:
        for t in range(1, T):                       # static unroll: T small & fixed
            h = jnp.tanh(xproj_ref[t]
                         + jnp.dot(h, w_hh, preferred_element_type=jnp.float32))
    else:
        def body(t, h):
            return jnp.tanh(xproj_ref[t]
                            + jnp.dot(h, w_hh, preferred_element_type=jnp.float32))
        h = jax.lax.fori_loop(1, T, body, h, unroll=4)

    # ---- head ------------------------------------------------------------------
    rnn_out = jnp.tanh(h)                           # forward()'s extra nonlinearity
    fc = jnp.tanh(jnp.dot(rnn_out, w_fc_ref[...],
                          preferred_element_type=jnp.float32) + b_fc_ref[...])
    out = jnp.dot(fc, w_out_ref[...],
                  preferred_element_type=jnp.float32) + b_out_ref[...]
    out_ref[...] = out * out_scale_ref[...] + out_shift_ref[...]


# ----------------------------------------------------------------------------- #
# Wrapper
# ----------------------------------------------------------------------------- #
def _num_tensorcores_per_chip():
    try:
        kind = jax.devices()[0].device_kind.lower()
    except Exception:
        return 1
    return 2 if "v7" in kind else 1


def _vmem_per_step_bytes(T, Bt, obs, Hp, Hmp, Ap):
    x_blk = 2 * T * _lane_pad_bytes(Bt, obs)        # double-buffered x block
    xproj = T * _lane_pad_bytes(Bt, Hp)             # scratch (single buffer)
    out_blk = 2 * _lane_pad_bytes(Bt, Ap)
    consts = 2 * (2 * _lane_pad_bytes(1, obs)
                  + _lane_pad_bytes(obs, Hp)
                  + _lane_pad_bytes(Hp, Hp)
                  + _lane_pad_bytes(1, Hp)
                  + _lane_pad_bytes(Hp, Hmp) + _lane_pad_bytes(1, Hmp)
                  + _lane_pad_bytes(Hmp, Ap) + 3 * _lane_pad_bytes(1, Ap))
    return x_blk + xproj + out_blk + consts


def _select_batch_tile(B, T, obs, Hp, Hmp, Ap, n_tc, vmem_budget_bytes):
    if B <= 8 or (n_tc == 1 and B <= 512):
        # single-TC chips (v5e/v6e): one big tile, no grid-step overhead
        Bt = _round_up(B, 8)
    elif n_tc >= 2:
        # v7x: give every TensorCore at least one tile of work
        Bt = min(_round_up(-(-B // n_tc), 8), 512)
    else:
        Bt = 512
    # shrink the tile if the per-step VMEM footprint would exceed the budget
    while Bt > 8 and _vmem_per_step_bytes(T, Bt, obs, Hp, Hmp, Ap) > vmem_budget_bytes:
        Bt = max(8, _round_up(Bt // 2, 8))
    return Bt


def recurrent_network_forward(x, params):
    """x: (B, T, obs_dim) or (B, obs_dim) float32. Returns (B, act_dim) float32."""
    if x.ndim == 2:
        x = x[:, None, :]                           # unsqueeze(1), as in torch forward
    x = x.astype(jnp.float32)
    B, T, obs = x.shape
    H = params["w_hh"].shape[0]
    Hm = params["w_fc"].shape[1]
    act_dim = params["w_out"].shape[1]

    # ---- lane-dense (128) padding of every hidden / output width ---------------
    Hp = _round_up(H, 128)
    Hmp = _round_up(Hm, 128)
    Ap = _round_up(act_dim, 128)

    # ---- per-generation batch tiling + derived VMEM budget ---------------------
    n_tc = _num_tensorcores_per_chip()
    vmem_cap = (48 << 20) if n_tc >= 2 else (100 << 20)   # v7x: 64 MiB physical
    Bt = _select_batch_tile(B, T, obs, Hp, Hmp, Ap, n_tc, int(0.75 * vmem_cap))
    nb = -(-B // Bt)
    Bp = nb * Bt

    # ---- time-major x: ONE wrapper transpose, no per-tile relayout -------------
    xt = jnp.transpose(x, (1, 0, 2))                       # (T, B, obs)
    xt = jnp.pad(xt, ((0, 0), (0, Bp - B), (0, 0)))        # (T, Bp, obs)

    # ---- zero-pad params to full 128-lane widths (exact: zero lanes stay zero) -
    f32 = jnp.float32
    in_shift = params["in_shift"].astype(f32)
    inv_scale = 1.0 / (params["in_scale"].astype(f32) + 1e-8)
    w_ih = jnp.pad(params["w_ih"].astype(f32), ((0, 0), (0, Hp - H)))
    w_hh = jnp.pad(params["w_hh"].astype(f32), ((0, Hp - H), (0, Hp - H)))
    b_rnn = jnp.pad(params["b_rnn"].astype(f32), ((0, 0), (0, Hp - H)))
    w_fc = jnp.pad(params["w_fc"].astype(f32), ((0, Hp - H), (0, Hmp - Hm)))
    b_fc = jnp.pad(params["b_fc"].astype(f32), ((0, 0), (0, Hmp - Hm)))
    w_out = jnp.pad(params["w_out"].astype(f32), ((0, Hmp - Hm), (0, Ap - act_dim)))
    b_out = jnp.pad(params["b_out"].astype(f32), ((0, 0), (0, Ap - act_dim)))
    out_scale = jnp.pad(params["out_scale"].astype(f32), ((0, 0), (0, Ap - act_dim)))
    out_shift = jnp.pad(params["out_shift"].astype(f32), ((0, 0), (0, Ap - act_dim)))

    args = (xt, in_shift, inv_scale, w_ih, w_hh, b_rnn,
            w_fc, b_fc, w_out, b_out, out_scale, out_shift)

    def const_spec(a):                              # whole array, same block each step
        return pl.BlockSpec(a.shape, lambda b, n=a.ndim: (0,) * n)

    in_specs = [pl.BlockSpec((T, Bt, obs), lambda b: (0, b, 0))]
    in_specs += [const_spec(a) for a in args[1:]]
    out_spec = pl.BlockSpec((Bt, Ap), lambda b: (b, 0))

    flops = (2 * T * Bp * obs * Hp                  # x @ W_ih (hoisted projection)
             + 2 * T * Bp * Hp * Hp                 # h @ W_hh (recurrence)
             + 2 * Bp * Hp * Hmp                    # fc
             + 2 * Bp * Hmp * Ap)                   # output layer
    transcendentals = T * Bp * Hp + Bp * Hp + Bp * Hmp
    bytes_accessed = 4 * (xt.size + Bp * Ap + sum(a.size for a in args[1:]))

    budget = _vmem_per_step_bytes(T, Bt, obs, Hp, Hmp, Ap)
    vmem_limit = int(min(vmem_cap, max(16 << 20, int(1.5 * budget))))

    out_full = pl.pallas_call(
        _rnn_kernel,
        out_shape=jax.ShapeDtypeStruct((Bp, Ap), jnp.float32),
        grid=(nb,),
        in_specs=in_specs,
        out_specs=out_spec,
        scratch_shapes=[pltpu.VMEM((T, Bt, Hp), jnp.float32)],
        compiler_params=pltpu.CompilerParams(
            dimension_semantics=("parallel",),
            vmem_limit_bytes=vmem_limit),
        cost_estimate=pl.CostEstimate(
            flops=flops, transcendentals=transcendentals,
            bytes_accessed=bytes_accessed),
    )(*args)

    return out_full[:B, :act_dim]


# ----------------------------------------------------------------------------- #
# Parameters & pure-JAX reference
# ----------------------------------------------------------------------------- #
def make_params(key, obs_dim, act_dim, rnn_hidden=64, mlp_hidden=64):
    """Deterministic synthetic parameters (PyTorch-style uniform init scales)."""
    ks = jax.random.split(key, 8)

    def unif(k, shape, fan):
        bound = 1.0 / jnp.sqrt(fan)
        return jax.random.uniform(k, shape, jnp.float32, -bound, bound)

    w_ih = unif(ks[0], (obs_dim, rnn_hidden), rnn_hidden)
    w_hh = unif(ks[1], (rnn_hidden, rnn_hidden), rnn_hidden)
    b_ih = unif(ks[2], (1, rnn_hidden), rnn_hidden)
    b_hh = unif(ks[3], (1, rnn_hidden), rnn_hidden)
    w_fc = unif(ks[4], (rnn_hidden, mlp_hidden), rnn_hidden)
    b_fc = unif(ks[5], (1, mlp_hidden), rnn_hidden)
    w_out = unif(ks[6], (mlp_hidden, act_dim), mlp_hidden)
    b_out = unif(ks[7], (1, act_dim), mlp_hidden)

    return dict(
        in_shift=jnp.zeros((1, obs_dim), jnp.float32),   # default transformations
        in_scale=jnp.ones((1, obs_dim), jnp.float32),
        w_ih=w_ih, w_hh=w_hh, b_rnn=b_ih + b_hh,
        w_fc=w_fc, b_fc=b_fc,
        w_out=w_out, b_out=b_out,
        out_scale=jnp.ones((1, act_dim), jnp.float32),
        out_shift=jnp.zeros((1, act_dim), jnp.float32),
    )


def reference_forward(x, p):
    """Pure-JAX reference mirroring the torch module, for validation."""
    if x.ndim == 2:
        x = x[:, None, :]
    B, T, _ = x.shape
    xn = (x - p["in_shift"][None]) / (p["in_scale"][None] + 1e-8)
    h = jnp.zeros((B, p["w_hh"].shape[0]), jnp.float32)
    for t in range(T):
        h = jnp.tanh(xn[:, t, :] @ p["w_ih"] + h @ p["w_hh"] + p["b_rnn"])
    rnn_out = jnp.tanh(h)
    fc = jnp.tanh(rnn_out @ p["w_fc"] + p["b_fc"])
    out = fc @ p["w_out"] + p["b_out"]
    return out * p["out_scale"] + p["out_shift"]


# TODO(synk): the torch module's SummaryWriter / activation logging and its cached
# hidden_state across calls are host-side bookkeeping, not translated (h0 is 0).
# TODO(synk): very long sequences (T >> 256) would want a time-chunk grid axis
# carrying h in VMEM scratch; the Bt auto-shrink keeps the current kernel in VMEM.

if __name__ == "__main__":
    obs_dim, act_dim = 16, 8
    rnn_hidden, mlp_hidden = 64, 64
    B, T = 2, 8

    key = jax.random.PRNGKey(0)
    k_x, k_p = jax.random.split(key)
    x = jax.random.normal(k_x, (B, T, obs_dim), jnp.float32)
    params = make_params(k_p, obs_dim, act_dim, rnn_hidden, mlp_hidden)

    out = recurrent_network_forward(x, params)
    out = jax.block_until_ready(out)

    ref = reference_forward(x, params)
    assert out.shape == (B, act_dim)
    assert jnp.allclose(out, ref, atol=2e-5, rtol=2e-5), "mismatch vs JAX reference"

    print("KERNEL_OK")
</pallas_src>

<mosaic_0001>
module attributes {stable_mosaic.version = 11 : i64} {
  func.func @_rnn_kernel(%arg0: i32, %arg1: memref<8x8x16xf32, #tpu.memory_space<vmem>>, %arg2: memref<1x16xf32, #tpu.memory_space<vmem>>, %arg3: memref<1x16xf32, #tpu.memory_space<vmem>>, %arg4: memref<16x128xf32, #tpu.memory_space<vmem>>, %arg5: memref<128x128xf32, #tpu.memory_space<vmem>>, %arg6: memref<1x128xf32, #tpu.memory_space<vmem>>, %arg7: memref<128x128xf32, #tpu.memory_space<vmem>>, %arg8: memref<1x128xf32, #tpu.memory_space<vmem>>, %arg9: memref<128x128xf32, #tpu.memory_space<vmem>>, %arg10: memref<1x128xf32, #tpu.memory_space<vmem>>, %arg11: memref<1x128xf32, #tpu.memory_space<vmem>>, %arg12: memref<1x128xf32, #tpu.memory_space<vmem>>, %arg13: memref<8x128xf32, #tpu.memory_space<vmem>>, %arg14: memref<8x8x128xf32, #tpu.memory_space<vmem>>) attributes {dimension_semantics = [#tpu.dimension_semantics<parallel>], iteration_bounds = array<i64: 1>, scalar_prefetch = 0 : i64, scratch_operands = 1 : i64, tpu.core_type = #tpu.core_type<tc>, window_params = [{transform_indices = @transform_0, window_bounds = array<i64: 8, 8, 16>}, {pipeline_mode = #tpu.pipeline_mode<synchronous>, transform_indices = @transform_1, window_bounds = array<i64: 1, 16>}, {pipeline_mode = #tpu.pipeline_mode<synchronous>, transform_indices = @transform_2, window_bounds = array<i64: 1, 16>}, {pipeline_mode = #tpu.pipeline_mode<synchronous>, transform_indices = @transform_3, window_bounds = array<i64: 16, 128>}, {pipeline_mode = #tpu.pipeline_mode<synchronous>, transform_indices = @transform_4, window_bounds = array<i64: 128, 128>}, {pipeline_mode = #tpu.pipeline_mode<synchronous>, transform_indices = @transform_5, window_bounds = array<i64: 1, 128>}, {pipeline_mode = #tpu.pipeline_mode<synchronous>, transform_indices = @transform_6, window_bounds = array<i64: 128, 128>}, {pipeline_mode = #tpu.pipeline_mode<synchronous>, transform_indices = @transform_7, window_bounds = array<i64: 1, 128>}, {pipeline_mode = #tpu.pipeline_mode<synchronous>, transform_indices = @transform_8, window_bounds = array<i64: 128, 128>}, {pipeline_mode = #tpu.pipeline_mode<synchronous>, transform_indices = @transform_9, window_bounds = array<i64: 1, 128>}, {pipeline_mode = #tpu.pipeline_mode<synchronous>, transform_indices = @transform_10, window_bounds = array<i64: 1, 128>}, {pipeline_mode = #tpu.pipeline_mode<synchronous>, transform_indices = @transform_11, window_bounds = array<i64: 1, 128>}, {transform_indices = @transform_12, window_bounds = array<i64: 8, 128>}]} {
    %c0 = arith.constant 0 : index
    %c0_0 = arith.constant 0 : index
    %c0_1 = arith.constant 0 : index
    %0 = vector.load %arg1[%c0, %c0_0, %c0_1] : memref<8x8x16xf32, #tpu.memory_space<vmem>>, vector<8x8x16xf32>
    %1 = vector.shape_cast %0 : vector<8x8x16xf32> to vector<64x16xf32>
    %c0_2 = arith.constant 0 : index
    %c0_3 = arith.constant 0 : index
    %2 = vector.load %arg2[%c0_2, %c0_3] : memref<1x16xf32, #tpu.memory_space<vmem>>, vector<1x16xf32>
    %3 = vector.broadcast %2 : vector<1x16xf32> to vector<64x16xf32>
    %4 = arith.subf %1, %3 : vector<64x16xf32>
    %c0_4 = arith.constant 0 : index
    %c0_5 = arith.constant 0 : index
    %5 = vector.load %arg3[%c0_4, %c0_5] : memref<1x16xf32, #tpu.memory_space<vmem>>, vector<1x16xf32>
    %6 = vector.broadcast %5 : vector<1x16xf32> to vector<64x16xf32>
    %7 = arith.mulf %4, %6 : vector<64x16xf32>
    %c0_6 = arith.constant 0 : index
    %c0_7 = arith.constant 0 : index
    %8 = vector.load %arg4[%c0_6, %c0_7] : memref<16x128xf32, #tpu.memory_space<vmem>>, vector<16x128xf32>
    %cst = arith.constant dense<0.000000e+00> : vector<64x128xf32>
    %9 = tpu.matmul %7, %8, %cst {dimension_numbers = #tpu.dot_dimension_numbers<[1], [0], [0], [1], [0, 0, 1, 1], [], []>} : vector<64x16xf32>, vector<16x128xf32>, vector<64x128xf32> -> vector<64x128xf32>
    %c0_8 = arith.constant 0 : index
    %c0_9 = arith.constant 0 : index
    %10 = vector.load %arg6[%c0_8, %c0_9] : memref<1x128xf32, #tpu.memory_space<vmem>>, vector<1x128xf32>
    %11 = vector.broadcast %10 : vector<1x128xf32> to vector<64x128xf32>
    %12 = arith.addf %9, %11 : vector<64x128xf32>
    %13 = vector.shape_cast %12 : vector<64x128xf32> to vector<8x8x128xf32>
    %c0_10 = arith.constant 0 : index
    %c0_11 = arith.constant 0 : index
    %c0_12 = arith.constant 0 : index
    %14 = vector.load %arg14[%c0_10, %c0_11, %c0_12] : memref<8x8x128xf32, #tpu.memory_space<vmem>>, vector<8x8x128xf32>
    tpu.vector_store %arg14[%c0_10, %c0_11, %c0_12], %13 {strides = array<i32>} : memref<8x8x128xf32, #tpu.memory_space<vmem>>, vector<8x8x128xf32>,
    %c0_13 = arith.constant 0 : index
    %c0_14 = arith.constant 0 : index
    %15 = vector.load %arg5[%c0_13, %c0_14] : memref<128x128xf32, #tpu.memory_space<vmem>>, vector<128x128xf32>
    %c0_15 = arith.constant 0 : index
    %c0_16 = arith.constant 0 : index
    %c0_17 = arith.constant 0 : index
    %16 = vector.load %arg14[%c0_15, %c0_16, %c0_17] : memref<8x8x128xf32, #tpu.memory_space<vmem>>, vector<1x8x128xf32>
    %17 = vector.shape_cast %16 : vector<1x8x128xf32> to vector<8x128xf32>
    %18 = math.tanh %17 : vector<8x128xf32>
    %c1 = arith.constant 1 : index
    %c0_18 = arith.constant 0 : index
    %c0_19 = arith.constant 0 : index
    %19 = vector.load %arg14[%c1, %c0_18, %c0_19] : memref<8x8x128xf32, #tpu.memory_space<vmem>>, vector<1x8x128xf32>
    %20 = vector.shape_cast %19 : vector<1x8x128xf32> to vector<8x128xf32>
    %cst_20 = arith.constant dense<0.000000e+00> : vector<8x128xf32>
    %21 = tpu.matmul %18, %15, %cst_20 {dimension_numbers = #tpu.dot_dimension_numbers<[1], [0], [0], [1], [0, 0, 1, 1], [], []>} : vector<8x128xf32>, vector<128x128xf32>, vector<8x128xf32> -> vector<8x128xf32>
    %22 = arith.addf %20, %21 : vector<8x128xf32>
    %23 = math.tanh %22 : vector<8x128xf32>
    %c2 = arith.constant 2 : index
    %c0_21 = arith.constant 0 : index
    %c0_22 = arith.constant 0 : index
    %24 = vector.load %arg14[%c2, %c0_21, %c0_22] : memref<8x8x128xf32, #tpu.memory_space<vmem>>, vector<1x8x128xf32>
    %25 = vector.shape_cast %24 : vector<1x8x128xf32> to vector<8x128xf32>
    %cst_23 = arith.constant dense<0.000000e+00> : vector<8x128xf32>
    %26 = tpu.matmul %23, %15, %cst_23 {dimension_numbers = #tpu.dot_dimension_numbers<[1], [0], [0], [1], [0, 0, 1, 1], [], []>} : vector<8x128xf32>, vector<128x128xf32>, vector<8x128xf32> -> vector<8x128xf32>
    %27 = arith.addf %25, %26 : vector<8x128xf32>
    %28 = math.tanh %27 : vector<8x128xf32>
    %c3 = arith.constant 3 : index
    %c0_24 = arith.constant 0 : index
    %c0_25 = arith.constant 0 : index
    %29 = vector.load %arg14[%c3, %c0_24, %c0_25] : memref<8x8x128xf32, #tpu.memory_space<vmem>>, vector<1x8x128xf32>
    %30 = vector.shape_cast %29 : vector<1x8x128xf32> to vector<8x128xf32>
    %cst_26 = arith.constant dense<0.000000e+00> : vector<8x128xf32>
    %31 = tpu.matmul %28, %15, %cst_26 {dimension_numbers = #tpu.dot_dimension_numbers<[1], [0], [0], [1], [0, 0, 1, 1], [], []>} : vector<8x128xf32>, vector<128x128xf32>, vector<8x128xf32> -> vector<8x128xf32>
    %32 = arith.addf %30, %31 : vector<8x128xf32>
    %33 = math.tanh %32 : vector<8x128xf32>
    %c4 = arith.constant 4 : index
    %c0_27 = arith.constant 0 : index
    %c0_28 = arith.constant 0 : index
    %34 = vector.load %arg14[%c4, %c0_27, %c0_28] : memref<8x8x128xf32, #tpu.memory_space<vmem>>, vector<1x8x128xf32>
    %35 = vector.shape_cast %34 : vector<1x8x128xf32> to vector<8x128xf32>
    %cst_29 = arith.constant dense<0.000000e+00> : vector<8x128xf32>
    %36 = tpu.matmul %33, %15, %cst_29 {dimension_numbers = #tpu.dot_dimension_numbers<[1], [0], [0], [1], [0, 0, 1, 1], [], []>} : vector<8x128xf32>, vector<128x128xf32>, vector<8x128xf32> -> vector<8x128xf32>
    %37 = arith.addf %35, %36 : vector<8x128xf32>
    %38 = math.tanh %37 : vector<8x128xf32>
    %c5 = arith.constant 5 : index
    %c0_30 = arith.constant 0 : index
    %c0_31 = arith.constant 0 : index
    %39 = vector.load %arg14[%c5, %c0_30, %c0_31] : memref<8x8x128xf32, #tpu.memory_space<vmem>>, vector<1x8x128xf32>
    %40 = vector.shape_cast %39 : vector<1x8x128xf32> to vector<8x128xf32>
    %cst_32 = arith.constant dense<0.000000e+00> : vector<8x128xf32>
    %41 = tpu.matmul %38, %15, %cst_32 {dimension_numbers = #tpu.dot_dimension_numbers<[1], [0], [0], [1], [0, 0, 1, 1], [], []>} : vector<8x128xf32>, vector<128x128xf32>, vector<8x128xf32> -> vector<8x128xf32>
    %42 = arith.addf %40, %41 : vector<8x128xf32>
    %43 = math.tanh %42 : vector<8x128xf32>
    %c6 = arith.constant 6 : index
    %c0_33 = arith.constant 0 : index
    %c0_34 = arith.constant 0 : index
    %44 = vector.load %arg14[%c6, %c0_33, %c0_34] : memref<8x8x128xf32, #tpu.memory_space<vmem>>, vector<1x8x128xf32>
    %45 = vector.shape_cast %44 : vector<1x8x128xf32> to vector<8x128xf32>
    %cst_35 = arith.constant dense<0.000000e+00> : vector<8x128xf32>
    %46 = tpu.matmul %43, %15, %cst_35 {dimension_numbers = #tpu.dot_dimension_numbers<[1], [0], [0], [1], [0, 0, 1, 1], [], []>} : vector<8x128xf32>, vector<128x128xf32>, vector<8x128xf32> -> vector<8x128xf32>
    %47 = arith.addf %45, %46 : vector<8x128xf32>
    %48 = math.tanh %47 : vector<8x128xf32>
    %c7 = arith.constant 7 : index
    %c0_36 = arith.constant 0 : index
    %c0_37 = arith.constant 0 : index
    %49 = vector.load %arg14[%c7, %c0_36, %c0_37] : memref<8x8x128xf32, #tpu.memory_space<vmem>>, vector<1x8x128xf32>
    %50 = vector.shape_cast %49 : vector<1x8x128xf32> to vector<8x128xf32>
    %cst_38 = arith.constant dense<0.000000e+00> : vector<8x128xf32>
    %51 = tpu.matmul %48, %15, %cst_38 {dimension_numbers = #tpu.dot_dimension_numbers<[1], [0], [0], [1], [0, 0, 1, 1], [], []>} : vector<8x128xf32>, vector<128x128xf32>, vector<8x128xf32> -> vector<8x128xf32>
    %52 = arith.addf %50, %51 : vector<8x128xf32>
    %53 = math.tanh %52 : vector<8x128xf32>
    %54 = math.tanh %53 : vector<8x128xf32>
    %c0_39 = arith.constant 0 : index
    %c0_40 = arith.constant 0 : index
    %55 = vector.load %arg7[%c0_39, %c0_40] : memref<128x128xf32, #tpu.memory_space<vmem>>, vector<128x128xf32>
    %cst_41 = arith.constant dense<0.000000e+00> : vector<8x128xf32>
    %56 = tpu.matmul %54, %55, %cst_41 {dimension_numbers = #tpu.dot_dimension_numbers<[1], [0], [0], [1], [0, 0, 1, 1], [], []>} : vector<8x128xf32>, vector<128x128xf32>, vector<8x128xf32> -> vector<8x128xf32>
    %c0_42 = arith.constant 0 : index
    %c0_43 = arith.constant 0 : index
    %57 = vector.load %arg8[%c0_42, %c0_43] : memref<1x128xf32, #tpu.memory_space<vmem>>, vector<1x128xf32>
    %58 = vector.broadcast %57 : vector<1x128xf32> to vector<8x128xf32>
    %59 = arith.addf %56, %58 : vector<8x128xf32>
    %60 = math.tanh %59 : vector<8x128xf32>
    %c0_44 = arith.constant 0 : index
    %c0_45 = arith.constant 0 : index
    %61 = vector.load %arg9[%c0_44, %c0_45] : memref<128x128xf32, #tpu.memory_space<vmem>>, vector<128x128xf32>
    %cst_46 = arith.constant dense<0.000000e+00> : vector<8x128xf32>
    %62 = tpu.matmul %60, %61, %cst_46 {dimension_numbers = #tpu.dot_dimension_numbers<[1], [0], [0], [1], [0, 0, 1, 1], [], []>} : vector<8x128xf32>, vector<128x128xf32>, vector<8x128xf32> -> vector<8x128xf32>
    %c0_47 = arith.constant 0 : index
    %c0_48 = arith.constant 0 : index
    %63 = vector.load %arg10[%c0_47, %c0_48] : memref<1x128xf32, #tpu.memory_space<vmem>>, vector<1x128xf32>
    %64 = vector.broadcast %63 : vector<1x128xf32> to vector<8x128xf32>
    %65 = arith.addf %62, %64 : vector<8x128xf32>
    %c0_49 = arith.constant 0 : index
    %c0_50 = arith.constant 0 : index
    %66 = vector.load %arg11[%c0_49, %c0_50] : memref<1x128xf32, #tpu.memory_space<vmem>>, vector<1x128xf32>
    %67 = vector.broadcast %66 : vector<1x128xf32> to vector<8x128xf32>
    %68 = arith.mulf %65, %67 : vector<8x128xf32>
    %c0_51 = arith.constant 0 : index
    %c0_52 = arith.constant 0 : index
    %69 = vector.load %arg12[%c0_51, %c0_52] : memref<1x128xf32, #tpu.memory_space<vmem>>, vector<1x128xf32>
    %70 = vector.broadcast %69 : vector<1x128xf32> to vector<8x128xf32>
    %71 = arith.addf %68, %70 : vector<8x128xf32>
    %c0_53 = arith.constant 0 : index
    %c0_54 = arith.constant 0 : index
    %72 = vector.load %arg13[%c0_53, %c0_54] : memref<8x128xf32, #tpu.memory_space<vmem>>, vector<8x128xf32>
    tpu.vector_store %arg13[%c0_53, %c0_54], %71 {strides = array<i32>} : memref<8x128xf32, #tpu.memory_space<vmem>>, vector<8x128xf32>,
    return
  }
  func.func @transform_0(%arg0: i32) -> (i32, i32, i32) {
    %c0_i32 = arith.constant 0 : i32
    %c0_i32_0 = arith.constant 0 : i32
    %c0_i32_1 = arith.constant 0 : i32
    return %c0_i32, %arg0, %c0_i32_0 : i32, i32, i32
  }
  func.func @transform_1(%arg0: i32) -> (i32, i32) {
    %c0_i32 = arith.constant 0 : i32
    %c0_i32_0 = arith.constant 0 : i32
    %c0_i32_1 = arith.constant 0 : i32
    return %c0_i32, %c0_i32_0 : i32, i32
  }
  func.func @transform_2(%arg0: i32) -> (i32, i32) {
    %c0_i32 = arith.constant 0 : i32
    %c0_i32_0 = arith.constant 0 : i32
    %c0_i32_1 = arith.constant 0 : i32
    return %c0_i32, %c0_i32_0 : i32, i32
  }
  func.func @transform_3(%arg0: i32) -> (i32, i32) {
    %c0_i32 = arith.constant 0 : i32
    %c0_i32_0 = arith.constant 0 : i32
    %c0_i32_1 = arith.constant 0 : i32
    return %c0_i32, %c0_i32_0 : i32, i32
  }
  func.func @transform_4(%arg0: i32) -> (i32, i32) {
    %c0_i32 = arith.constant 0 : i32
    %c0_i32_0 = arith.constant 0 : i32
    %c0_i32_1 = arith.constant 0 : i32
    return %c0_i32, %c0_i32_0 : i32, i32
  }
  func.func @transform_5(%arg0: i32) -> (i32, i32) {
    %c0_i32 = arith.constant 0 : i32
    %c0_i32_0 = arith.constant 0 : i32
    %c0_i32_1 = arith.constant 0 : i32
    return %c0_i32, %c0_i32_0 : i32, i32
  }
  func.func @transform_6(%arg0: i32) -> (i32, i32) {
    %c0_i32 = arith.constant 0 : i32
    %c0_i32_0 = arith.constant 0 : i32
    %c0_i32_1 = arith.constant 0 : i32
    return %c0_i32, %c0_i32_0 : i32, i32
  }
  func.func @transform_7(%arg0: i32) -> (i32, i32) {
    %c0_i32 = arith.constant 0 : i32
    %c0_i32_0 = arith.constant 0 : i32
    %c0_i32_1 = arith.constant 0 : i32
    return %c0_i32, %c0_i32_0 : i32, i32
  }
  func.func @transform_8(%arg0: i32) -> (i32, i32) {
    %c0_i32 = arith.constant 0 : i32
    %c0_i32_0 = arith.constant 0 : i32
    %c0_i32_1 = arith.constant 0 : i32
    return %c0_i32, %c0_i32_0 : i32, i32
  }
  func.func @transform_9(%arg0: i32) -> (i32, i32) {
    %c0_i32 = arith.constant 0 : i32
    %c0_i32_0 = arith.constant 0 : i32
    %c0_i32_1 = arith.constant 0 : i32
    return %c0_i32, %c0_i32_0 : i32, i32
  }
  func.func @transform_10(%arg0: i32) -> (i32, i32) {
    %c0_i32 = arith.constant 0 : i32
    %c0_i32_0 = arith.constant 0 : i32
    %c0_i32_1 = arith.constant 0 : i32
    return %c0_i32, %c0_i32_0 : i32, i32
  }
  func.func @transform_11(%arg0: i32) -> (i32, i32) {
    %c0_i32 = arith.constant 0 : i32
    %c0_i32_0 = arith.constant 0 : i32
    %c0_i32_1 = arith.constant 0 : i32
    return %c0_i32, %c0_i32_0 : i32, i32
  }
  func.func @transform_12(%arg0: i32) -> (i32, i32) {
    %c0_i32 = arith.constant 0 : i32
    %c0_i32_0 = arith.constant 0 : i32
    return %arg0, %c0_i32 : i32, i32
  }
}

</mosaic_0001>

<bundles_post_ra>
// kernel: tpu_custom_call.1
= control target key start
LH: loop header
LB: loop body
LE: loop exit
PB: predicated region body
PF: predicated region fallthrough
CT: control target
= control target key end

     0   :  { %17 = vsyncpa [#allocation4], 0  ;;  %s2208_s0 = inlined_call_operand.hbm [shape: f32[8,8,16], index: 0, kind: input, shape index: {}]   ;;  %s2209_s1 = inlined_call_operand.vmem [shape: f32[1,16], index: 1, kind: input, shape index: {}]   ;;  %s2210_s2 = inlined_call_operand.vmem [shape: f32[1,16], index: 2, kind: input, shape index: {}]   ;;  %s2211_s3 = inlined_call_operand.hbm [shape: f32[16,128], index: 3, kind: input, shape index: {}]   ;;  %s2212_s4 = inlined_call_operand.hbm [shape: f32[128,128], index: 4, kind: input, shape index: {}]   ;;  %s2213_s5 = inlined_call_operand.vmem [shape: f32[1,128], index: 5, kind: input, shape index: {}]   ;;  %s2214_s6 = inlined_call_operand.hbm [shape: f32[128,128], index: 6, kind: input, shape index: {}]   ;;  %s2215_s7 = inlined_call_operand.vmem [shape: f32[1,128], index: 7, kind: input, shape index: {}]   ;;  %s2216_s8 = inlined_call_operand.hbm [shape: f32[128,128], index: 8, kind: input, shape index: {}]   ;;  %s2217_s9 = inlined_call_operand.vmem [shape: f32[1,128], index: 9, kind: input, shape index: {}]   ;;  %s2218_s10 = inlined_call_operand.vmem [shape: f32[1,128], index: 10, kind: input, shape index: {}]   ;;  %s2219_s11 = inlined_call_operand.vmem [shape: f32[1,128], index: 11, kind: input, shape index: {}]   ;;  %s2220_s12 = inlined_call_operand.hbm [shape: f32[8,128], index: 12, kind: output, shape index: {}]  }
   0x1   :  { %18 = vsyncpa [#allocation7], 0 }
   0x2   :  { %19 = vsyncpa [#allocation10], 0 }
   0x3   :  { %20 = vsyncpa [#allocation5], 0  ;;  %s1720_s21 = smov [#allocation6]   ;;  %s1721_s23 = smov [#allocation9]  }
   0x4   :  { %s42_s22 = sshll.u32 %s1720_s21, 4  ;;  %s68_s24 = sshll.u32 %s1721_s23, 4  ;;  %s43_s22 = int_to_ptr.vmem [resolvable:$true] %s42_s22  ;;  %s69_s24 = int_to_ptr.vmem [resolvable:$true] %s68_s24 }
   0x5   :  { %s1600_s25 = scalar_lea.vmem %s43_s22, 256  ;;  %p1605_p1 = scmp.lt.s32.totalorder %s43_s22, %s43_s22 }
   0x6   :  { %p1601_p0 = scmp.ne.s32.totalorder %s43_s22, %s1600_s25  ;;  %p1606_p2 = scmp.lt.s32.totalorder %s1600_s25, %s1600_s25 }
   0x8   :  { %p1607_p3 = por %p1606_p2, %p1605_p1 }
   0xa   :  { %p1608_p4 = pnand %p1607_p3, %p1601_p0 }
   0xc   :  { %1611 = shalt.err (!%p1608_p4)
}
   0xd   :  { %s1722_s26 = smov 128   ;;  %s1723_s27 = smov 8  }
   0xe   :  { %48 = dma.hbm_to_vmem [thread:$0]  %s2211_s3, 256, %s43_s22, [#allocation7], %s1722_s26, %s1722_s26, %s1723_s27  }
   0xf   :  { %s1620_s30 = scalar_lea.vmem %s69_s24, 2048  ;;  %p1625_p6 = scmp.lt.s32.totalorder %s69_s24, %s69_s24 }
  0x10   :  { %p1621_p5 = scmp.ne.s32.totalorder %s69_s24, %s1620_s30  ;;  %p1626_p7 = scmp.lt.s32.totalorder %s1620_s30, %s1620_s30 }
  0x12   :  { %p1627_p8 = por %p1626_p7, %p1625_p6 }
  0x14   :  { %p1628_p9 = pnand %p1627_p8, %p1621_p5 }
  0x16   :  { %1631 = shalt.err (!%p1628_p9)
}
  0x17   :  { %74 = dma.hbm_to_vmem [thread:$0]  %s2214_s6, 2048, %s69_s24, [#allocation10], %s1722_s26, %s1722_s26, %s1723_s27  }
  0x18   :  { %s1724_s15 = smov [#allocation3]   ;;  %s1725_s17 = smov [#allocation8]  }
  0x19   :  { %s26_s16 = sshll.u32 %s1724_s15, 4  ;;  %s54_s18 = sshll.u32 %s1725_s17, 4  ;;  %s27_s16 = int_to_ptr.vmem [resolvable:$true] %s26_s16  ;;  %s55_s18 = int_to_ptr.vmem [resolvable:$true] %s54_s18 }
  0x1a   :  { %s1640_s3 = scalar_lea.vmem %s27_s16, 1024  ;;  %p1645_p11 = scmp.lt.s32.totalorder %s27_s16, %s27_s16 }
  0x1b   :  { %p1641_p10 = scmp.ne.s32.totalorder %s27_s16, %s1640_s3  ;;  %p1646_p12 = scmp.lt.s32.totalorder %s1640_s3, %s1640_s3 }
  0x1d   :  { %p1647_p13 = por %p1646_p12, %p1645_p11 }
  0x1f   :  { %p1648_p0 = pnand %p1647_p13, %p1641_p10 }
  0x21   :  { %1651 = shalt.err (!%p1648_p0)
}
  0x22   :  { %32 = dma.hbm_to_vmem [thread:$0]  %s2208_s0, 1024, %s27_s16, [#allocation4], %s1722_s26, %s1722_s26, %s1723_s27  }
  0x23   :  { %s1660_s6 = scalar_lea.vmem %s55_s18, 2048  ;;  %p1665_p2 = scmp.lt.s32.totalorder %s55_s18, %s55_s18 }
  0x24   :  { %p1661_p1 = scmp.ne.s32.totalorder %s55_s18, %s1660_s6  ;;  %p1666_p3 = scmp.lt.s32.totalorder %s1660_s6, %s1660_s6 }
  0x26   :  { %p1667_p4 = por %p1666_p3, %p1665_p2 }
  0x28   :  { %p1668_p5 = pnand %p1667_p4, %p1661_p1 }
  0x2a   :  { %1671 = shalt.err (!%p1668_p5)
}
  0x2b   :  { %60 = dma.hbm_to_vmem [thread:$0]  %s2212_s4, 2048, %s55_s18, [#allocation7], %s1722_s26, %s1722_s26, %s1723_s27  }
  0x2c   :  { %s1726_s23 = smov [#allocation11]  }
  0x2d   :  { %s82_s24 = sshll.u32 %s1726_s23, 4  ;;  %s83_s24 = int_to_ptr.vmem [resolvable:$true] %s82_s24 }
  0x2e   :  { %s1680_s25 = scalar_lea.vmem %s83_s24, 2048  ;;  %p1685_p7 = scmp.lt.s32.totalorder %s83_s24, %s83_s24 }
  0x2f   :  { %p1681_p6 = scmp.ne.s32.totalorder %s83_s24, %s1680_s25  ;;  %p1686_p8 = scmp.lt.s32.totalorder %s1680_s25, %s1680_s25 }
  0x31   :  { %p1687_p9 = por %p1686_p8, %p1685_p7 }
  0x33   :  { %p1688_p10 = pnand %p1687_p9, %p1681_p6 }
  0x35   :  { %1691 = shalt.err (!%p1688_p10)
}
  0x36   :  { %88 = dma.hbm_to_vmem [thread:$0]  %s2216_s8, 2048, %s83_s24, [#allocation10], %s1722_s26, %s1722_s26, %s1723_s27  }
  0x37   :  { %1712 = dma.done.wait [#allocation4], 1024  }
  0x38   :  { %1713 = vsyncadd [#allocation4], 4294966272 }
  0x39   :  { %1714 = dma.done.wait [#allocation7], 2304  }
  0x3a   :  { %1715 = vsyncadd [#allocation7], 4294964992 }
  0x3b   :  { %1716 = dma.done.wait [#allocation10], 4096  }
  0x3c   :  { %1717 = vsyncadd [#allocation10], 4294963200  ;;  %v1727_v0 = vmov 0.0   ;;  %v149_v1 = vld [vmem:[#allocation6 + $0x8] sm:$0xff]  ;;  %v148_v2 = vld [vmem:[#allocation6] sm:$0xff]  ;;  %vm157_vm0 = vcmask 130048  }
  0x3d   :  { %1247 = vmatprep.subr.mxu1 %v1727_v0  ;;  %v110_v3 = vld [vmem:[#allocation3] sm:$0xff]  ;;  %1231 = vmatprep.subr.mxu0 %v149_v1  ;;  %v111_v6 = vld [vmem:[#allocation3 + $0x8] sm:$0xff]  ;;  %v1846_v13 = vld [vmem:[#allocation8 + $0x68] sm:$0xff]  ;;  %vm1728_vm1 = vmmov 0  }
  0x3e   :  { %v1829_v4 = vld [vmem:[%s2209_s1] ss:$0 sm:$0xff]  ;;  %1232 = vmatpush3.msra.mxu0 %v149_v1  ;;  %v1838_v9 = vld [vmem:[#allocation8 + $0x78] sm:$0xff]  ;;  %v1852_v14 = vld [vmem:[#allocation8 + $0x60] sm:$0xff]  ;;  %1279 = vmatprep.mubr.msk.f32.mxu1 %vm1728_vm1, %v1727_v0 }
  0x3f   :  { %v1834_v5 = vld [vmem:[%s2210_s2] ss:$0 sm:$0xff]  ;;  %v125_v7 = vsub.f32 %v110_v3, %v1829_v4  ;;  %v126_v8 = vsub.f32 %v111_v6, %v1829_v4  ;;  %1233 = vmatprep.subr.mxu0 %v148_v2  ;;  %1248 = vmatpush3.msra.mxu1 %v1838_v9  ;;  %v1857_v15 = vld [vmem:[#allocation8 + $0x58] sm:$0xff]  ;;  %v1879_v17 = vld [vmem:[#allocation8 + $0x48] sm:$0xff] }
  0x40   :  { %v1840_v10 = vld [vmem:[#allocation8 + $0x70] sm:$0xff]  ;;  %1234 = vmatpush3.msra.mxu0 %v148_v2  ;;  %1249 = vmatprep.subr.mxu1 %v1727_v0  ;;  %v1884_v18 = vld [vmem:[#allocation8 + $0x40] sm:$0xff]  ;;  %v1890_v19 = vld [vmem:[#allocation8 + $0x38] sm:$0xff] }
  0x41   :  { %v140_v11 = vmul.f32 %v1834_v5, %v125_v7  ;;  %v141_v12 = vmul.f32 %v1834_v5, %v126_v8  ;;  %1250 = vmatpush3.msra.mxu1 %v1840_v10  ;;  %1282 = vmatprep.subr.mxu0 %v1727_v0  ;;  %v1863_v16 = vld [vmem:[#allocation8 + $0x50] sm:$0xff]  ;;  %v1898_v21 = vld [vmem:[#allocation8 + $0x28] sm:$0xff]  ;;  %v1905_v22 = vld [vmem:[#allocation8 + $0x20] sm:$0xff] }
  0x42   :  { %1251 = vmatprep.subr.mxu1 %v1727_v0  ;;  %v1896_v20 = vld [vmem:[#allocation8 + $0x30] sm:$0xff]  ;;  %v1911_v23 = vld [vmem:[#allocation8 + $0x18] sm:$0xff]  ;;  %v1923_v25 = vld [vmem:[#allocation8 + $0x8] sm:$0xff] }
  0x43   :  { %1235 = vmatprep.mubr.msk.f32.mxu0 %vm157_vm0, %v140_v11  ;;  %1252 = vmatpush3.msra.mxu1 %v1846_v13  ;;  %v1917_v24 = vld [vmem:[#allocation8 + $0x10] sm:$0xff]  ;;  %v1929_v26 = vld [vmem:[#allocation8] sm:$0xff]  ;;  %v113_v34 = vld [vmem:[#allocation3 + $0x18] sm:$0xff] }
  0x44   :  { %1236 = vmatmul.mubr.msk.f32.vlgmr.msra.gmra.mxu0 %vm157_vm0, %v141_v12  ;;  %1253 = vmatprep.subr.mxu1 %v1727_v0  ;;  %v1946_v28 = vld [vmem:[%s2213_s5] ss:$0 sm:$0xff]  ;;  %v112_v32 = vld [vmem:[#allocation3 + $0x10] sm:$0xff]  ;;  %v128_v35 = vsub.f32 %v113_v34, %v1829_v4  ;;  %v115_v40 = vld [vmem:[#allocation3 + $0x28] sm:$0xff] }
  0x45   :  { %1283 = vmatpush3.msra.mxu0 %v1838_v9  ;;  %1254 = vmatpush3.msra.mxu1 %v1852_v14  ;;  %v127_v33 = vsub.f32 %v112_v32, %v1829_v4  ;;  %v114_v38 = vld [vmem:[#allocation3 + $0x20] sm:$0xff]  ;;  %v130_v41 = vsub.f32 %v115_v40, %v1829_v4  ;;  %v116_v42 = vld [vmem:[#allocation3 + $0x30] sm:$0xff]  ;;  %v117_v43 = vld [vmem:[#allocation3 + $0x38] sm:$0xff] }
  0x46   :  { %1284 = vmatprep.subr.mxu0 %v1727_v0  ;;  %1255 = vmatprep.subr.mxu1 %v1727_v0  ;;  %v143_v37 = vmul.f32 %v1834_v5, %v128_v35  ;;  %v129_v39 = vsub.f32 %v114_v38, %v1829_v4  ;;  %v131_v45 = vsub.f32 %v116_v42, %v1829_v4  ;;  %v839_v32 = vld [vmem:[#allocation9 + $0x38] sm:$0xff]  ;;  %v837_v34 = vld [vmem:[#allocation9 + $0x28] sm:$0xff]  ;;  %v836_v35 = vld [vmem:[#allocation9 + $0x20] sm:$0xff] }
  0x47   :  { %1285 = vmatpush3.msra.mxu0 %v1840_v10  ;;  %1256 = vmatpush3.msra.mxu1 %v1857_v15  ;;  %v142_v36 = vmul.f32 %v1834_v5, %v127_v33  ;;  %v132_v46 = vsub.f32 %v117_v43, %v1829_v4  ;;  %v145_v47 = vmul.f32 %v1834_v5, %v130_v41  ;;  %v838_v33 = vld [vmem:[#allocation9 + $0x30] sm:$0xff]  ;;  %v833_v38 = vld [vmem:[#allocation9 + $0x8] sm:$0xff]  ;;  %v941_v40 = vld [vmem:[#allocation11 + $0x78] sm:$0xff] }
  0x48   :  { %1286 = vmatprep.subr.mxu0 %v1727_v0  ;;  %1257 = vmatprep.subr.mxu1 %v1727_v0  ;;  %v144_v44 = vmul.f32 %v1834_v5, %v129_v39  ;;  %v146_v48 = vmul.f32 %v1834_v5, %v131_v45  ;;  %v832_v39 = vld [vmem:[#allocation9] sm:$0xff]  ;;  %v940_v41 = vld [vmem:[#allocation11 + $0x70] sm:$0xff]  ;;  %v939_v42 = vld [vmem:[#allocation11 + $0x68] sm:$0xff] }
  0x49   :  { %1287 = vmatpush3.msra.mxu0 %v1846_v13  ;;  %1258 = vmatpush3.msra.mxu1 %v1863_v16  ;;  %v147_v49 = vmul.f32 %v1834_v5, %v132_v46  ;;  %v938_v43 = vld [vmem:[#allocation11 + $0x60] sm:$0xff]  ;;  %v936_v45 = vld [vmem:[#allocation11 + $0x50] sm:$0xff]  ;;  %v935_v46 = vld [vmem:[#allocation11 + $0x48] sm:$0xff] }
  0x4a   :  { %1288 = vmatprep.subr.mxu0 %v1727_v0  ;;  %1259 = vmatprep.subr.mxu1 %v1727_v0 }
  0x4b   :  { %1289 = vmatpush3.msra.mxu0 %v1852_v14  ;;  %1260 = vmatpush3.msra.mxu1 %v1879_v17 }
  0x4c   :  { %1290 = vmatprep.subr.mxu0 %v1727_v0  ;;  %1261 = vmatprep.subr.mxu1 %v1727_v0 }
  0x4d   :  { %1291 = vmatpush3.msra.mxu0 %v1857_v15  ;;  %1262 = vmatpush3.msra.mxu1 %v1884_v18 }
  0x4e   :  { %1292 = vmatprep.subr.mxu0 %v1727_v0  ;;  %1263 = vmatprep.subr.mxu1 %v1727_v0 }
  0x4f   :  { %1293 = vmatpush3.msra.mxu0 %v1863_v16  ;;  %1264 = vmatpush3.msra.mxu1 %v1890_v19 }
  0x50   :  { %1294 = vmatprep.subr.mxu0 %v1727_v0  ;;  %1265 = vmatprep.subr.mxu1 %v1727_v0 }
  0x51   :  { %1295 = vmatpush3.msra.mxu0 %v1879_v17  ;;  %1266 = vmatpush3.msra.mxu1 %v1896_v20 }
  0x52   :  { %1296 = vmatprep.subr.mxu0 %v1727_v0  ;;  %1267 = vmatprep.subr.mxu1 %v1727_v0 }
  0x53   :  { %1297 = vmatpush3.msra.mxu0 %v1884_v18  ;;  %1268 = vmatpush3.msra.mxu1 %v1898_v21 }
  0x54   :  { %1298 = vmatprep.subr.mxu0 %v1727_v0  ;;  %1269 = vmatprep.subr.mxu1 %v1727_v0 }
  0x55   :  { %1299 = vmatpush3.msra.mxu0 %v1890_v19  ;;  %1270 = vmatpush3.msra.mxu1 %v1905_v22 }
  0x56   :  { %1300 = vmatprep.subr.mxu0 %v1727_v0  ;;  %1271 = vmatprep.subr.mxu1 %v1727_v0 }
  0x57   :  { %1301 = vmatpush3.msra.mxu0 %v1896_v20  ;;  %1272 = vmatpush3.msra.mxu1 %v1911_v23 }
  0x58   :  { %1302 = vmatprep.subr.mxu0 %v1727_v0  ;;  %1273 = vmatprep.subr.mxu1 %v1727_v0 }
  0x59   :  { %1303 = vmatpush3.msra.mxu0 %v1898_v21  ;;  %1274 = vmatpush3.msra.mxu1 %v1917_v24 }
  0x5a   :  { %1304 = vmatprep.subr.mxu0 %v1727_v0  ;;  %1275 = vmatprep.subr.mxu1 %v1727_v0 }
  0x5b   :  { %1305 = vmatpush3.msra.mxu0 %v1905_v22  ;;  %1276 = vmatpush3.msra.mxu1 %v1923_v25 }
  0x5c   :  { %1306 = vmatprep.subr.mxu0 %v1727_v0  ;;  %1277 = vmatprep.subr.mxu1 %v1727_v0 }
  0x5d   :  { %1307 = vmatpush3.msra.mxu0 %v1911_v23  ;;  %1278 = vmatpush3.msra.mxu1 %v1929_v26 }
  0x5e   :  { %1308 = vmatprep.subr.mxu0 %v1727_v0  ;;  %1317 = vmatprep.subr.mxu1 %v1727_v0 }
  0x5f   :  { %1309 = vmatpush3.msra.mxu0 %v1917_v24  ;;  %1238 = vmatprep.mubr.msk.f32.mxu0 %vm157_vm0, %v142_v36  ;;  %v835_v36 = vld [vmem:[#allocation9 + $0x18] sm:$0xff] }
  0x60   :  { %1310 = vmatprep.subr.mxu0 %v1727_v0  ;;  %1239 = vmatmul.mubr.msk.f32.gmra.mxu0 %vm157_vm0, %v143_v37  ;;  %v834_v37 = vld [vmem:[#allocation9 + $0x10] sm:$0xff] }
  0x61   :  { %1311 = vmatpush3.msra.mxu0 %v1923_v25  ;;  %1241 = vmatprep.mubr.msk.f32.mxu0 %vm157_vm0, %v144_v44  ;;  %v937_v44 = vld [vmem:[#allocation11 + $0x58] sm:$0xff] }
  0x62   :  { %1312 = vmatprep.subr.mxu0 %v1727_v0 }
  0x63   :  { %1313 = vmatpush3.msra.mxu0 %v1929_v26 }
  0x64   :  { %1352 = vmatprep.subr.mxu0 %v1727_v0  ;;  %1242 = vmatmul.mubr.msk.f32.gmra.mxu0 %vm157_vm0, %v145_v47 }
  0x65   :  { %1244 = vmatprep.mubr.msk.f32.mxu0 %vm157_vm0, %v146_v48 }
  0x68   :  { %1245 = vmatmul.mubr.msk.f32.gmra.mxu0 %vm157_vm0, %v147_v49 }
  0x69   :  { %1314 = vmatprep.mubr.msk.f32.mxu0 %vm1728_vm1, %v1727_v0 }
 0x104   :  { %v1941_v27 = vpop.f32.mrf.mxu0 }
 0x105   :  { %v254_v50 = vadd.f32 %v1941_v27, %v1946_v28 }
 0x106   :  { %v248_v29 = vpop.f32.mrf.mxu0 }
 0x107   :  { %v249_v30 = vadd.f32 %v1946_v28, %v248_v29 }
 0x109   :  { %1572 = vtanh.f32 %v249_v30  ;;  %v841_v30 = vld [vmem:[#allocation9 + $0x48] sm:$0xff] }
 0x116   :  { %v1573_v31 = vpop.eup %1572 }
 0x117   :  { %1280 = vmatmul.mubr.f32.vlgmr.msra.gmra.mxu1 %v1573_v31  ;;  %v840_v31 = vld [vmem:[#allocation9 + $0x40] sm:$0xff] }
 0x118   :  { %1318 = vmatpush3.msra.mxu1 %v1838_v9  ;;  %1349 = vmatprep.mubr.msk.f32.mxu1 %vm1728_vm1, %v1727_v0 }
 0x119   :  { %1319 = vmatprep.subr.mxu1 %v1727_v0 }
 0x11a   :  { %1320 = vmatpush3.msra.mxu1 %v1840_v10 }
 0x11b   :  { %1321 = vmatprep.subr.mxu1 %v1727_v0 }
 0x11c   :  { %1322 = vmatpush3.msra.mxu1 %v1846_v13 }
 0x11d   :  { %1323 = vmatprep.subr.mxu1 %v1727_v0 }
 0x11e   :  { %1324 = vmatpush3.msra.mxu1 %v1852_v14 }
 0x11f   :  { %1325 = vmatprep.subr.mxu1 %v1727_v0 }
 0x120   :  { %1326 = vmatpush3.msra.mxu1 %v1857_v15  ;;  %v1240_v55 = vpop.f32.mrf.mxu0 }
 0x121   :  { %1327 = vmatprep.subr.mxu1 %v1727_v0  ;;  %v264_v3 = vadd.f32 %v1240_v55, %v1946_v28  ;;  %v932_v55 = vld [vmem:[#allocation11 + $0x30] sm:$0xff] }
 0x122   :  { %1328 = vmatpush3.msra.mxu1 %v1863_v16  ;;  %v258_v56 = vpop.f32.mrf.mxu0 }
 0x123   :  { %1329 = vmatprep.subr.mxu1 %v1727_v0  ;;  %v259_v61 = vadd.f32 %v1946_v28, %v258_v56  ;;  %v931_v56 = vld [vmem:[#allocation11 + $0x28] sm:$0xff] }
 0x124   :  { %1330 = vmatpush3.msra.mxu1 %v1879_v17  ;;  %v2039_v57 = vpop.f32.mrf.mxu0 }
 0x125   :  { %1331 = vmatprep.subr.mxu1 %v1727_v0 }
 0x126   :  { %1332 = vmatpush3.msra.mxu1 %v1884_v18  ;;  %v2041_v58 = vpop.f32.mrf.mxu0 }
 0x127   :  { %1333 = vmatprep.subr.mxu1 %v1727_v0  ;;  %v269_v8 = vadd.f32 %v1946_v28, %v2041_v58  ;;  %v928_v58 = vld [vmem:[#allocation11 + $0x10] sm:$0xff] }
 0x128   :  { %1334 = vmatpush3.msra.mxu1 %v1890_v19  ;;  %v2043_v59 = vpop.f32.mrf.mxu0 }
 0x129   :  { %1335 = vmatprep.subr.mxu1 %v1727_v0  ;;  %v284_v47 = vadd.f32 %v2043_v59, %v1946_v28  ;;  %v927_v59 = vld [vmem:[#allocation11 + $0x8] sm:$0xff] }
 0x12a   :  { %1336 = vmatpush3.msra.mxu1 %v1896_v20  ;;  %v2045_v60 = vpop.f32.mrf.mxu0 }
 0x12b   :  { %1337 = vmatprep.subr.mxu1 %v1727_v0 }
 0x12c   :  { %1338 = vmatpush3.msra.mxu1 %v1898_v21 }
 0x12d   :  { %1339 = vmatprep.subr.mxu1 %v1727_v0 }
 0x12e   :  { %1340 = vmatpush3.msra.mxu1 %v1905_v22 }
 0x12f   :  { %1341 = vmatprep.subr.mxu1 %v1727_v0 }
 0x130   :  { %1342 = vmatpush3.msra.mxu1 %v1911_v23 }
 0x131   :  { %1343 = vmatprep.subr.mxu1 %v1727_v0 }
 0x132   :  { %1344 = vmatpush3.msra.mxu1 %v1917_v24 }
 0x133   :  { %1345 = vmatprep.subr.mxu1 %v1727_v0 }
 0x134   :  { %1346 = vmatpush3.msra.mxu1 %v1923_v25 }
 0x135   :  { %1347 = vmatprep.subr.mxu1 %v1727_v0 }
 0x136   :  { %1348 = vmatpush3.msra.mxu1 %v1929_v26 }
 0x137   :  { %1387 = vmatprep.subr.mxu1 %v1727_v0 }
 0x1d7   :  { %v381_v51 = vpop.f32.mrf.mxu1 }
 0x1d8   :  { %v385_v52 = vadd.f32 %v381_v51, %v254_v50 }
 0x1d9   :  { %v1281_v53 = vpop.f32.mrf.mxu1 }
 0x1da   :  { %1574 = vtanh.f32 %v385_v52  ;;  %v934_v53 = vld [vmem:[#allocation11 + $0x40] sm:$0xff] }
 0x1e7   :  { %v1575_v54 = vpop.eup %1574 }
 0x1e8   :  { %1315 = vmatmul.mubr.f32.vlgmr.msra.gmra.mxu0 %v1575_v54  ;;  %v933_v54 = vld [vmem:[#allocation11 + $0x38] sm:$0xff] }
 0x1e9   :  { %1353 = vmatpush3.msra.mxu0 %v1838_v9  ;;  %1384 = vmatprep.mubr.msk.f32.mxu0 %vm1728_vm1, %v1727_v0 }
 0x1ea   :  { %1354 = vmatprep.subr.mxu0 %v1727_v0 }
 0x1eb   :  { %1355 = vmatpush3.msra.mxu0 %v1840_v10 }
 0x1ec   :  { %1356 = vmatprep.subr.mxu0 %v1727_v0 }
 0x1ed   :  { %1357 = vmatpush3.msra.mxu0 %v1846_v13 }
 0x1ee   :  { %1358 = vmatprep.subr.mxu0 %v1727_v0 }
 0x1ef   :  { %1359 = vmatpush3.msra.mxu0 %v1852_v14 }
 0x1f0   :  { %1360 = vmatprep.subr.mxu0 %v1727_v0 }
 0x1f1   :  { %1361 = vmatpush3.msra.mxu0 %v1857_v15 }
 0x1f2   :  { %1362 = vmatprep.subr.mxu0 %v1727_v0 }
 0x1f3   :  { %1363 = vmatpush3.msra.mxu0 %v1863_v16 }
 0x1f4   :  { %1364 = vmatprep.subr.mxu0 %v1727_v0 }
 0x1f5   :  { %1365 = vmatpush3.msra.mxu0 %v1879_v17 }
 0x1f6   :  { %1366 = vmatprep.subr.mxu0 %v1727_v0 }
 0x1f7   :  { %1367 = vmatpush3.msra.mxu0 %v1884_v18 }
 0x1f8   :  { %1368 = vmatprep.subr.mxu0 %v1727_v0 }
 0x1f9   :  { %1369 = vmatpush3.msra.mxu0 %v1890_v19 }
 0x1fa   :  { %1370 = vmatprep.subr.mxu0 %v1727_v0 }
 0x1fb   :  { %1371 = vmatpush3.msra.mxu0 %v1896_v20 }
 0x1fc   :  { %1372 = vmatprep.subr.mxu0 %v1727_v0 }
 0x1fd   :  { %1373 = vmatpush3.msra.mxu0 %v1898_v21 }
 0x1fe   :  { %1374 = vmatprep.subr.mxu0 %v1727_v0 }
 0x1ff   :  { %1375 = vmatpush3.msra.mxu0 %v1905_v22 }
 0x200   :  { %1376 = vmatprep.subr.mxu0 %v1727_v0 }
 0x201   :  { %1377 = vmatpush3.msra.mxu0 %v1911_v23 }
 0x202   :  { %1378 = vmatprep.subr.mxu0 %v1727_v0 }
 0x203   :  { %1379 = vmatpush3.msra.mxu0 %v1917_v24 }
 0x204   :  { %1380 = vmatprep.subr.mxu0 %v1727_v0 }
 0x205   :  { %1381 = vmatpush3.msra.mxu0 %v1923_v25 }
 0x206   :  { %1382 = vmatprep.subr.mxu0 %v1727_v0 }
 0x207   :  { %1383 = vmatpush3.msra.mxu0 %v1929_v26 }
 0x208   :  { %1422 = vmatprep.subr.mxu0 %v1727_v0 }
 0x2a8   :  { %v455_v62 = vpop.f32.mrf.mxu0 }
 0x2a9   :  { %v459_v63 = vadd.f32 %v455_v62, %v259_v61  ;;  %v1064_v61 = vld [vmem:[%s2215_s7] ss:$0 sm:$0xff]  ;;  %s1729_s7 = smov [#allocation12]  }
 0x2aa   :  { %v1316_v1 = vpop.f32.mrf.mxu0  ;;  %s1042_s18 = sshll.u32 %s1729_s7, 4  ;;  %s1043_s18 = int_to_ptr.vmem [resolvable:$true] %s1042_s18 }
 0x2ab   :  { %1576 = vtanh.f32 %v459_v63  ;;  %s1692_s3 = scalar_lea.vmem %s1043_s18, 128  ;;  %p1697_p12 = scmp.lt.s32.totalorder %s1043_s18, %s1043_s18 }
 0x2ac   :  { %p1693_p11 = scmp.ne.s32.totalorder %s1043_s18, %s1692_s3  ;;  %p1698_p13 = scmp.lt.s32.totalorder %s1692_s3, %s1692_s3 }
 0x2ae   :  { %p1699_p0 = por %p1698_p13, %p1697_p12 }
 0x2b0   :  { %p1700_p1 = pnand %p1699_p0, %p1693_p11 }
 0x2b8   :  { %v1577_v2 = vpop.eup %1576 }
 0x2b9   :  { %1350 = vmatmul.mubr.f32.vlgmr.msra.gmra.mxu1 %v1577_v2 }
 0x2ba   :  { %1388 = vmatpush3.msra.mxu1 %v1838_v9  ;;  %1419 = vmatprep.mubr.msk.f32.mxu1 %vm1728_vm1, %v1727_v0 }
 0x2bb   :  { %1389 = vmatprep.subr.mxu1 %v1727_v0 }
 0x2bc   :  { %1390 = vmatpush3.msra.mxu1 %v1840_v10 }
 0x2bd   :  { %1391 = vmatprep.subr.mxu1 %v1727_v0 }
 0x2be   :  { %1392 = vmatpush3.msra.mxu1 %v1846_v13 }
 0x2bf   :  { %1393 = vmatprep.subr.mxu1 %v1727_v0 }
 0x2c0   :  { %1394 = vmatpush3.msra.mxu1 %v1852_v14 }
 0x2c1   :  { %1395 = vmatprep.subr.mxu1 %v1727_v0 }
 0x2c2   :  { %1396 = vmatpush3.msra.mxu1 %v1857_v15 }
 0x2c3   :  { %1397 = vmatprep.subr.mxu1 %v1727_v0 }
 0x2c4   :  { %1398 = vmatpush3.msra.mxu1 %v1863_v16 }
 0x2c5   :  { %1399 = vmatprep.subr.mxu1 %v1727_v0 }
 0x2c6   :  { %1400 = vmatpush3.msra.mxu1 %v1879_v17 }
 0x2c7   :  { %1401 = vmatprep.subr.mxu1 %v1727_v0 }
 0x2c8   :  { %1402 = vmatpush3.msra.mxu1 %v1884_v18 }
 0x2c9   :  { %1403 = vmatprep.subr.mxu1 %v1727_v0 }
 0x2ca   :  { %1404 = vmatpush3.msra.mxu1 %v1890_v19 }
 0x2cb   :  { %1405 = vmatprep.subr.mxu1 %v1727_v0 }
 0x2cc   :  { %1406 = vmatpush3.msra.mxu1 %v1896_v20 }
 0x2cd   :  { %1407 = vmatprep.subr.mxu1 %v1727_v0 }
 0x2ce   :  { %1408 = vmatpush3.msra.mxu1 %v1898_v21 }
 0x2cf   :  { %1409 = vmatprep.subr.mxu1 %v1727_v0 }
 0x2d0   :  { %1410 = vmatpush3.msra.mxu1 %v1905_v22 }
 0x2d1   :  { %1411 = vmatprep.subr.mxu1 %v1727_v0 }
 0x2d2   :  { %1412 = vmatpush3.msra.mxu1 %v1911_v23 }
 0x2d3   :  { %1413 = vmatprep.subr.mxu1 %v1727_v0 }
 0x2d4   :  { %1414 = vmatpush3.msra.mxu1 %v1917_v24 }
 0x2d5   :  { %1415 = vmatprep.subr.mxu1 %v1727_v0 }
 0x2d6   :  { %1416 = vmatpush3.msra.mxu1 %v1923_v25 }
 0x2d7   :  { %1417 = vmatprep.subr.mxu1 %v1727_v0 }
 0x2d8   :  { %1418 = vmatpush3.msra.mxu1 %v1929_v26 }
 0x2d9   :  { %1457 = vmatprep.subr.mxu1 %v1727_v0 }
 0x379   :  { %v529_v4 = vpop.f32.mrf.mxu1 }
 0x37a   :  { %v533_v5 = vadd.f32 %v529_v4, %v264_v3  ;;  %v1065_v3 = vld [vmem:[%s2217_s9] ss:$0 sm:$0xff] }
 0x37b   :  { %v1351_v6 = vpop.f32.mrf.mxu1 }
 0x37c   :  { %1578 = vtanh.f32 %v533_v5 }
 0x389   :  { %v1579_v7 = vpop.eup %1578 }
 0x38a   :  { %1385 = vmatmul.mubr.f32.vlgmr.msra.gmra.mxu0 %v1579_v7  ;;  %v1067_v7 = vld [vmem:[%s2219_s11] ss:$0 sm:$0xff] }
 0x38b   :  { %1423 = vmatpush3.msra.mxu0 %v1838_v9  ;;  %1454 = vmatprep.mubr.msk.f32.mxu0 %vm1728_vm1, %v1727_v0 }
 0x38c   :  { %1424 = vmatprep.subr.mxu0 %v1727_v0 }
 0x38d   :  { %1425 = vmatpush3.msra.mxu0 %v1840_v10 }
 0x38e   :  { %1426 = vmatprep.subr.mxu0 %v1727_v0 }
 0x38f   :  { %1427 = vmatpush3.msra.mxu0 %v1846_v13 }
 0x390   :  { %1428 = vmatprep.subr.mxu0 %v1727_v0 }
 0x391   :  { %1429 = vmatpush3.msra.mxu0 %v1852_v14 }
 0x392   :  { %1430 = vmatprep.subr.mxu0 %v1727_v0 }
 0x393   :  { %1431 = vmatpush3.msra.mxu0 %v1857_v15 }
 0x394   :  { %1432 = vmatprep.subr.mxu0 %v1727_v0 }
 0x395   :  { %1433 = vmatpush3.msra.mxu0 %v1863_v16 }
 0x396   :  { %1434 = vmatprep.subr.mxu0 %v1727_v0 }
 0x397   :  { %1435 = vmatpush3.msra.mxu0 %v1879_v17 }
 0x398   :  { %1436 = vmatprep.subr.mxu0 %v1727_v0 }
 0x399   :  { %1437 = vmatpush3.msra.mxu0 %v1884_v18 }
 0x39a   :  { %1438 = vmatprep.subr.mxu0 %v1727_v0 }
 0x39b   :  { %1439 = vmatpush3.msra.mxu0 %v1890_v19 }
 0x39c   :  { %1440 = vmatprep.subr.mxu0 %v1727_v0 }
 0x39d   :  { %1441 = vmatpush3.msra.mxu0 %v1896_v20 }
 0x39e   :  { %1442 = vmatprep.subr.mxu0 %v1727_v0 }
 0x39f   :  { %1443 = vmatpush3.msra.mxu0 %v1898_v21 }
 0x3a0   :  { %1444 = vmatprep.subr.mxu0 %v1727_v0 }
 0x3a1   :  { %1445 = vmatpush3.msra.mxu0 %v1905_v22 }
 0x3a2   :  { %1446 = vmatprep.subr.mxu0 %v1727_v0 }
 0x3a3   :  { %1447 = vmatpush3.msra.mxu0 %v1911_v23 }
 0x3a4   :  { %1448 = vmatprep.subr.mxu0 %v1727_v0 }
 0x3a5   :  { %1449 = vmatpush3.msra.mxu0 %v1917_v24 }
 0x3a6   :  { %1450 = vmatprep.subr.mxu0 %v1727_v0 }
 0x3a7   :  { %1451 = vmatpush3.msra.mxu0 %v1923_v25 }
 0x3a8   :  { %1452 = vmatprep.subr.mxu0 %v1727_v0 }
 0x3a9   :  { %1453 = vmatpush3.msra.mxu0 %v1929_v26 }
 0x3aa   :  { %1492 = vmatprep.subr.mxu0 %v1727_v0 }
 0x44a   :  { %v603_v11 = vpop.f32.mrf.mxu0 }
 0x44b   :  { %v607_v12 = vadd.f32 %v603_v11, %v269_v8 }
 0x44c   :  { %v1386_v27 = vpop.f32.mrf.mxu0 }
 0x44d   :  { %1580 = vtanh.f32 %v607_v12 }
 0x45a   :  { %v1581_v29 = vpop.eup %1580 }
 0x45b   :  { %1420 = vmatmul.mubr.f32.vlgmr.msra.gmra.mxu1 %v1581_v29 }
 0x45c   :  { %1458 = vmatpush3.msra.mxu1 %v1838_v9  ;;  %1489 = vmatprep.mubr.msk.f32.mxu1 %vm1728_vm1, %v1727_v0  ;;  %v274_v9 = vadd.f32 %v2039_v57, %v1946_v28  ;;  %v929_v57 = vld [vmem:[#allocation11 + $0x18] sm:$0xff] }
 0x45d   :  { %1459 = vmatprep.subr.mxu1 %v1727_v0 }
 0x45e   :  { %1460 = vmatpush3.msra.mxu1 %v1840_v10 }
 0x45f   :  { %1461 = vmatprep.subr.mxu1 %v1727_v0 }
 0x460   :  { %1462 = vmatpush3.msra.mxu1 %v1846_v13 }
 0x461   :  { %1463 = vmatprep.subr.mxu1 %v1727_v0 }
 0x462   :  { %1464 = vmatpush3.msra.mxu1 %v1852_v14 }
 0x463   :  { %1465 = vmatprep.subr.mxu1 %v1727_v0 }
 0x464   :  { %1466 = vmatpush3.msra.mxu1 %v1857_v15 }
 0x465   :  { %1467 = vmatprep.subr.mxu1 %v1727_v0 }
 0x466   :  { %1468 = vmatpush3.msra.mxu1 %v1863_v16  ;;  %v279_v16 = vadd.f32 %v1946_v28, %v2045_v60  ;;  %v930_v28 = vld [vmem:[#allocation11 + $0x20] sm:$0xff] }
 0x467   :  { %1469 = vmatprep.subr.mxu1 %v1727_v0  ;;  %v926_v60 = vld [vmem:[#allocation11] sm:$0xff] }
 0x468   :  { %1470 = vmatpush3.msra.mxu1 %v1879_v17 }
 0x469   :  { %1471 = vmatprep.subr.mxu1 %v1727_v0 }
 0x46a   :  { %1472 = vmatpush3.msra.mxu1 %v1884_v18 }
 0x46b   :  { %1473 = vmatprep.subr.mxu1 %v1727_v0 }
 0x46c   :  { %1474 = vmatpush3.msra.mxu1 %v1890_v19 }
 0x46d   :  { %1475 = vmatprep.subr.mxu1 %v1727_v0 }
 0x46e   :  { %1476 = vmatpush3.msra.mxu1 %v1896_v20 }
 0x46f   :  { %1477 = vmatprep.subr.mxu1 %v1727_v0 }
 0x470   :  { %1478 = vmatpush3.msra.mxu1 %v1898_v21  ;;  %v847_v21 = vld [vmem:[#allocation9 + $0x78] sm:$0xff] }
 0x471   :  { %1479 = vmatprep.subr.mxu1 %v1727_v0 }
 0x472   :  { %1480 = vmatpush3.msra.mxu1 %v1905_v22  ;;  %v846_v22 = vld [vmem:[#allocation9 + $0x70] sm:$0xff] }
 0x473   :  { %1481 = vmatprep.subr.mxu1 %v1727_v0 }
 0x474   :  { %1482 = vmatpush3.msra.mxu1 %v1911_v23  ;;  %v845_v23 = vld [vmem:[#allocation9 + $0x68] sm:$0xff] }
 0x475   :  { %1483 = vmatprep.subr.mxu1 %v1727_v0 }
 0x476   :  { %1484 = vmatpush3.msra.mxu1 %v1917_v24  ;;  %v844_v24 = vld [vmem:[#allocation9 + $0x60] sm:$0xff] }
 0x477   :  { %1485 = vmatprep.subr.mxu1 %v1727_v0 }
 0x478   :  { %1486 = vmatpush3.msra.mxu1 %v1923_v25  ;;  %v843_v25 = vld [vmem:[#allocation9 + $0x58] sm:$0xff] }
 0x479   :  { %1487 = vmatprep.subr.mxu1 %v1727_v0 }
 0x47a   :  { %1488 = vmatpush3.msra.mxu1 %v1929_v26  ;;  %v842_v26 = vld [vmem:[#allocation9 + $0x50] sm:$0xff] }
 0x47b   :  { %1527 = vmatprep.subr.mxu1 %v1727_v0 }
 0x51b   :  { %v677_v10 = vpop.f32.mrf.mxu1 }
 0x51c   :  { %v681_v13 = vadd.f32 %v677_v10, %v274_v9 }
 0x51d   :  { %v1421_v14 = vpop.f32.mrf.mxu1 }
 0x51e   :  { %1582 = vtanh.f32 %v681_v13 }
 0x52b   :  { %v1583_v15 = vpop.eup %1582 }
 0x52c   :  { %1455 = vmatmul.mubr.f32.vlgmr.msra.gmra.mxu0 %v1583_v15 }
 0x52d   :  { %1524 = vmatprep.mubr.msk.f32.mxu0 %vm1728_vm1, %v1727_v0  ;;  %1493 = vmatpush3.msra.mxu0 %v847_v21 }
 0x52e   :  { %1494 = vmatprep.subr.mxu0 %v1727_v0 }
 0x52f   :  { %1495 = vmatpush3.msra.mxu0 %v846_v22 }
 0x530   :  { %1496 = vmatprep.subr.mxu0 %v1727_v0 }
 0x531   :  { %1497 = vmatpush3.msra.mxu0 %v845_v23 }
 0x532   :  { %1498 = vmatprep.subr.mxu0 %v1727_v0 }
 0x533   :  { %1499 = vmatpush3.msra.mxu0 %v844_v24 }
 0x534   :  { %1500 = vmatprep.subr.mxu0 %v1727_v0 }
 0x535   :  { %1501 = vmatpush3.msra.mxu0 %v843_v25 }
 0x536   :  { %1502 = vmatprep.subr.mxu0 %v1727_v0 }
 0x537   :  { %1503 = vmatpush3.msra.mxu0 %v842_v26 }
 0x538   :  { %1504 = vmatprep.subr.mxu0 %v1727_v0 }
 0x539   :  { %1505 = vmatpush3.msra.mxu0 %v841_v30 }
 0x53a   :  { %1506 = vmatprep.subr.mxu0 %v1727_v0 }
 0x53b   :  { %1507 = vmatpush3.msra.mxu0 %v840_v31 }
 0x53c   :  { %1508 = vmatprep.subr.mxu0 %v1727_v0 }
 0x53d   :  { %1509 = vmatpush3.msra.mxu0 %v839_v32 }
 0x53e   :  { %1510 = vmatprep.subr.mxu0 %v1727_v0 }
 0x53f   :  { %1511 = vmatpush3.msra.mxu0 %v838_v33 }
 0x540   :  { %1512 = vmatprep.subr.mxu0 %v1727_v0 }
 0x541   :  { %1513 = vmatpush3.msra.mxu0 %v837_v34 }
 0x542   :  { %1514 = vmatprep.subr.mxu0 %v1727_v0 }
 0x543   :  { %1515 = vmatpush3.msra.mxu0 %v836_v35 }
 0x544   :  { %1516 = vmatprep.subr.mxu0 %v1727_v0 }
 0x545   :  { %1517 = vmatpush3.msra.mxu0 %v835_v36 }
 0x546   :  { %1518 = vmatprep.subr.mxu0 %v1727_v0 }
 0x547   :  { %1519 = vmatpush3.msra.mxu0 %v834_v37 }
 0x548   :  { %1520 = vmatprep.subr.mxu0 %v1727_v0 }
 0x549   :  { %1521 = vmatpush3.msra.mxu0 %v833_v38 }
 0x54a   :  { %1522 = vmatprep.subr.mxu0 %v1727_v0 }
 0x54b   :  { %1523 = vmatpush3.msra.mxu0 %v832_v39 }
 0x5ec   :  { %v751_v17 = vpop.f32.mrf.mxu0 }
 0x5ed   :  { %v755_v18 = vadd.f32 %v751_v17, %v279_v16 }
 0x5ee   :  { %v1456_v19 = vpop.f32.mrf.mxu0 }
 0x5ef   :  { %1584 = vtanh.f32 %v755_v18 }
 0x5fc   :  { %v1585_v20 = vpop.eup %1584 }
 0x5fd   :  { %1490 = vmatmul.mubr.f32.vlgmr.msra.gmra.mxu1 %v1585_v20 }
 0x5fe   :  { %1559 = vmatprep.mubr.msk.f32.mxu1 %vm1728_vm1, %v1727_v0  ;;  %1528 = vmatpush3.msra.mxu1 %v941_v40 }
 0x5ff   :  { %1529 = vmatprep.subr.mxu1 %v1727_v0 }
 0x600   :  { %1530 = vmatpush3.msra.mxu1 %v940_v41 }
 0x601   :  { %1531 = vmatprep.subr.mxu1 %v1727_v0 }
 0x602   :  { %1532 = vmatpush3.msra.mxu1 %v939_v42 }
 0x603   :  { %1533 = vmatprep.subr.mxu1 %v1727_v0 }
 0x604   :  { %1534 = vmatpush3.msra.mxu1 %v938_v43 }
 0x605   :  { %1535 = vmatprep.subr.mxu1 %v1727_v0 }
 0x606   :  { %1536 = vmatpush3.msra.mxu1 %v937_v44 }
 0x607   :  { %1537 = vmatprep.subr.mxu1 %v1727_v0 }
 0x608   :  { %1538 = vmatpush3.msra.mxu1 %v936_v45 }
 0x609   :  { %1539 = vmatprep.subr.mxu1 %v1727_v0 }
 0x60a   :  { %1540 = vmatpush3.msra.mxu1 %v935_v46 }
 0x60b   :  { %1541 = vmatprep.subr.mxu1 %v1727_v0 }
 0x60c   :  { %1542 = vmatpush3.msra.mxu1 %v934_v53 }
 0x60d   :  { %1543 = vmatprep.subr.mxu1 %v1727_v0 }
 0x60e   :  { %1544 = vmatpush3.msra.mxu1 %v933_v54 }
 0x60f   :  { %1545 = vmatprep.subr.mxu1 %v1727_v0 }
 0x610   :  { %1546 = vmatpush3.msra.mxu1 %v932_v55 }
 0x611   :  { %1547 = vmatprep.subr.mxu1 %v1727_v0 }
 0x612   :  { %1548 = vmatpush3.msra.mxu1 %v931_v56 }
 0x613   :  { %1549 = vmatprep.subr.mxu1 %v1727_v0 }
 0x614   :  { %1550 = vmatpush3.msra.mxu1 %v930_v28 }
 0x615   :  { %1551 = vmatprep.subr.mxu1 %v1727_v0 }
 0x616   :  { %1552 = vmatpush3.msra.mxu1 %v929_v57 }
 0x617   :  { %1553 = vmatprep.subr.mxu1 %v1727_v0 }
 0x618   :  { %1554 = vmatpush3.msra.mxu1 %v928_v58 }
 0x619   :  { %1555 = vmatprep.subr.mxu1 %v1727_v0 }
 0x61a   :  { %1556 = vmatpush3.msra.mxu1 %v927_v59 }
 0x61b   :  { %1557 = vmatprep.subr.mxu1 %v1727_v0  ;;  %v1066_v0 = vld [vmem:[%s2218_s10] ss:$0 sm:$0xff] }
 0x61c   :  { %1558 = vmatpush3.msra.mxu1 %v926_v60 }
 0x6bd   :  { %v825_v48 = vpop.f32.mrf.mxu1 }
 0x6be   :  { %v829_v49 = vadd.f32 %v825_v48, %v284_v47 }
 0x6bf   :  { %v1491_v50 = vpop.f32.mrf.mxu1 }
 0x6c0   :  { %1586 = vtanh.f32 %v829_v49 }
 0x6cd   :  { %v1587_v51 = vpop.eup %1586 }
 0x6ce   :  { %1588 = vtanh.f32 %v1587_v51 }
 0x6db   :  { %v1589_v52 = vpop.eup %1588 }
 0x6dc   :  { %1525 = vmatmul.mubr.f32.vlgmr.msra.gmra.mxu0 %v1589_v52 }
 0x79c   :  { %v921_v62 = vpop.f32.mrf.mxu0 }
 0x79d   :  { %v922_v63 = vadd.f32 %v1064_v61, %v921_v62 }
 0x79e   :  { %v1526_v1 = vpop.f32.mrf.mxu0 }
 0x79f   :  { %1590 = vtanh.f32 %v922_v63 }
 0x7ac   :  { %v1591_v2 = vpop.eup %1590 }
 0x7ad   :  { %1560 = vmatmul.mubr.f32.vlgmr.msra.gmra.mxu1 %v1591_v2 }
 0x86d   :  { %v1015_v4 = vpop.f32.mrf.mxu1 }
 0x86e   :  { %v1016_v5 = vadd.f32 %v1065_v3, %v1015_v4 }
 0x86f   :  { %v1561_v6 = vpop.f32.mrf.mxu1 }
 0x870   :  { %v1026_v8 = vmul.f32 %v1066_v0, %v1016_v5 }
 0x872   :  { %v1034_v11 = vadd.f32 %v1067_v7, %v1026_v8 }
 0x874   :  { %1035 = vst [vmem:[#allocation12] sm:$0xff] %v1034_v11 }
 0x875   :  { %1703 = shalt.err (!%p1700_p1)
}
 0x876   :  { %1045 = dma.vmem_to_hbm [thread:$0]  %s1043_s18, 128, %s2220_s12, [#allocation5]  }
 0x877   :  { %1718 = dma.done.wait [#allocation5], 128  }
 0x878   :  { %1719 = vsyncadd [#allocation5], 4294967168 }
 0x879   :  { %1049 = vsyncpa [#allocation4], 1 }
 0x87a   :  { %1050 = vsyncpa [#allocation7], 1 }
 0x87b   :  { %1051 = vsyncpa [#allocation10], 1 }
 0x87c   :  { %1052 = vsyncpa [#allocation5], 1 }

</bundles_post_ra>
